<compile_context>
chip_gen: v6e
topology: v6e:2x2x1
jax: 0.10.0
libtpu: 0.0.40
codegen_flags: <defaults>
</compile_context>

<pallas_src>
import math
import functools

import jax
import jax.numpy as jnp
from jax.experimental import pallas as pl
from jax.experimental.pallas import tpu as pltpu

FP16_MIN = -65504.0   # torch.finfo(torch.float16).min
FP16_MAX = 65504.0    # torch.finfo(torch.float16).max


# -----------------------------------------------------------------------------
# Hardware-aware sizing helpers
# -----------------------------------------------------------------------------
def _vmem_cap_bytes():
    """Per-core VMEM capacity; conservative (v7x) fallback if query fails."""
    cap = 64 << 20
    try:
        info = pltpu.get_tpu_info()
        cap = int(getattr(info, "vmem_capacity_bytes", cap))
    except Exception:
        pass
    return cap


def _vmem_budget(block_bytes, cap):
    """Scoped-VMEM budget: ~double-buffered blocks + slack, clamped below the
    physical per-core capacity with headroom (64 MiB on v7x, 128 MiB v5e/v6e)."""
    ceiling = max(cap - (12 << 20), 8 << 20)
    want = 4 * int(block_bytes) + (2 << 20)
    floor = min(16 << 20, ceiling)
    return int(max(min(want, ceiling), floor))


def _pick_tile(dim, target, quantum=8):
    """Largest divisor of `dim` that is <= target and a multiple of `quantum`;
    falls back to the full dim (always BlockSpec-legal)."""
    if dim <= target:
        return dim
    t = (target // quantum) * quantum
    while t >= quantum:
        if dim % t == 0:
            return t
        t -= quantum
    return dim


def _pick_head_group(num_heads, head_dim):
    """Smallest head group whose lane width (G*hd) is a multiple of 128 so all
    HBM<->VMEM blocks are lane-dense; otherwise use all heads (full-E block)."""
    for g in range(1, num_heads + 1):
        if num_heads % g == 0 and (g * head_dim) % 128 == 0:
            return g
    return num_heads


# -----------------------------------------------------------------------------
# Kernel 1: fused Q/K/V projections, tiled over (batch, seq-tile, out-feature
# tile). Q is pre-scaled by 1/sqrt(head_dim) so the attention kernel never
# touches the (tq, N) score tile with a divide.
# -----------------------------------------------------------------------------
def _qkv_proj_kernel(inv_scale,
                     xq_ref, xk_ref, xv_ref,
                     wq_ref, bq_ref, wk_ref, bk_ref, wv_ref, bv_ref,
                     q_ref, k_ref, v_ref):
    xq = xq_ref[0]                 # (tn, E) — operands kept in input dtype
    xk = xk_ref[0]                 # (bf16 in -> bf16 MXU operands)
    xv = xv_ref[0]

    q = jnp.dot(xq, wq_ref[...], preferred_element_type=jnp.float32) + bq_ref[...]
    k = jnp.dot(xk, wk_ref[...], preferred_element_type=jnp.float32) + bk_ref[...]
    v = jnp.dot(xv, wv_ref[...], preferred_element_type=jnp.float32) + bv_ref[...]

    q_ref[0] = (q * inv_scale).astype(q_ref.dtype)
    k_ref[0] = k.astype(k_ref.dtype)
    v_ref[0] = v.astype(v_ref.dtype)


# -----------------------------------------------------------------------------
# Kernel 2: attention for one (batch, head-group, query-tile) step.
# The q/k/v blocks are lane-dense (1, *, G*hd) slices of the (B, N, E) arrays;
# each head inside the group is a static lane-slice of the resident VMEM block
# (no HBM transpose, no per-head HBM traffic). ctx is written straight back in
# (B, N, E) layout; probs go to the dense (B, H, N, N) output.
# -----------------------------------------------------------------------------
def _attention_kernel(heads_per_group, head_dim, has_mask, *refs):
    if has_mask:
        q_ref, k_ref, v_ref, mask_ref, probs_ref, ctx_ref = refs
    else:
        q_ref, k_ref, v_ref, probs_ref, ctx_ref = refs

    q = q_ref[0]          # (tq, G*hd), already scaled by 1/sqrt(hd)
    k = k_ref[0]          # (N,  G*hd)
    v = v_ref[0]          # (N,  G*hd)

    if has_mask:
        mask_is_zero = mask_ref[0, 0] == 0        # (tq, N); computed once

    for gi in range(heads_per_group):
        lo = gi * head_dim
        hi = lo + head_dim
        qg = q[:, lo:hi]
        kg = k[:, lo:hi]
        vg = v[:, lo:hi]

        # Contract the last dims of both operands -> no explicit kh.T.
        scores = jax.lax.dot_general(
            qg, kg, (((1,), (1,)), ((), ())),
            preferred_element_type=jnp.float32)               # (tq, N)

        if has_mask:
            scores = jnp.where(mask_is_zero, FP16_MIN, scores)

        # Numerically stable softmax; reciprocal routed to the EUP slot.
        m = jnp.max(scores, axis=-1, keepdims=True)
        e = jnp.exp(scores - m)
        denom = jnp.sum(e, axis=-1, keepdims=True)
        probs = e * pl.reciprocal(denom, approx=True)

        probs_store = probs.astype(probs_ref.dtype)           # cast once,
        probs_ref[0, gi] = probs_store                        # reuse below
        probs_mm = probs_store if probs_ref.dtype == v.dtype else probs.astype(v.dtype)

        ctx = jnp.dot(probs_mm, vg, preferred_element_type=jnp.float32)
        ctx_ref[0, :, lo:hi] = ctx.astype(ctx_ref.dtype)      # (B, N, E) layout


# -----------------------------------------------------------------------------
# Kernel 3: output projection — one full-depth (tn, E) @ (E, te) matmul per
# step (no per-head accumulation, no scratch).
# -----------------------------------------------------------------------------
def _out_proj_kernel(ctx_ref, wo_ref, bo_ref, out_ref):
    out = jnp.dot(ctx_ref[0], wo_ref[...],
                  preferred_element_type=jnp.float32) + bo_ref[...]
    out_ref[0] = out.astype(out_ref.dtype)


# -----------------------------------------------------------------------------
# Wrapper
# -----------------------------------------------------------------------------
def multi_head_attention(x_q, x_k, x_v, params, num_heads, mask=None,
                         probs_dtype=None):
    """params = (wq, bq, wk, bk, wv, bv, wo, bo); weights stored [E_in, E_out]
    (pre-transposed vs. torch), biases [1, E]. mask, if given, is [B, 1, N, N]
    (nonzero = keep). probs_dtype defaults to the input dtype; bf16 halves the
    dominant probs HBM stream. Inputs/weights in bf16 keep the MXU bf16-native.
    Returns (output [B, N, E], attention_probs [B, H, N, N])."""
    B, N, E = x_q.shape
    assert E % num_heads == 0, "embed_dim must be divisible by num_heads"
    hd = E // num_heads
    wq, bq, wk, bk, wv, bv, wo, bo = params

    dtype = x_q.dtype
    if probs_dtype is None:
        probs_dtype = dtype
    itemsize = jnp.dtype(dtype).itemsize
    w_itemsize = jnp.dtype(wq.dtype).itemsize
    probs_itemsize = jnp.dtype(probs_dtype).itemsize
    inv_scale = 1.0 / math.sqrt(hd)
    has_mask = mask is not None

    cap = _vmem_cap_bytes()

    # Mask streamed as int8 (4x less DMA than f32, one compare per element).
    if has_mask:
        mask_i8 = (mask != 0).astype(jnp.int8)

    # ---------------- stage 1: fused Q/K/V projections -----------------------
    tn1 = _pick_tile(N, 256, 8)
    te1 = _pick_tile(E, 512, 128)

    x_spec = pl.BlockSpec((1, tn1, E), lambda b, ni, ei: (b, ni, 0))
    w_spec = pl.BlockSpec((E, te1), lambda b, ni, ei: (0, ei))
    bias_spec = pl.BlockSpec((1, te1), lambda b, ni, ei: (0, ei))
    out1_spec = pl.BlockSpec((1, tn1, te1), lambda b, ni, ei: (b, ni, ei))

    qkv_block_bytes = (3 * tn1 * E + 3 * tn1 * te1) * itemsize \
        + 3 * (E * te1 + te1) * w_itemsize + 3 * tn1 * te1 * 4

    q, k, v = pl.pallas_call(
        functools.partial(_qkv_proj_kernel, inv_scale),
        out_shape=(jax.ShapeDtypeStruct((B, N, E), dtype),) * 3,
        grid=(B, N // tn1, E // te1),
        in_specs=[x_spec, x_spec, x_spec,
                  w_spec, bias_spec, w_spec, bias_spec, w_spec, bias_spec],
        out_specs=(out1_spec, out1_spec, out1_spec),
        compiler_params=pltpu.CompilerParams(
            dimension_semantics=("parallel", "parallel", "parallel"),
            vmem_limit_bytes=_vmem_budget(qkv_block_bytes, cap)),
        cost_estimate=pl.CostEstimate(
            flops=6 * B * N * E * E, transcendentals=0,
            bytes_accessed=int(6 * B * N * E * itemsize
                               + 3 * B * (N // tn1) * (E * E + E) * w_itemsize)),
    )(x_q, x_k, x_v, wq, bq, wk, bk, wv, bv)

    # ---------------- stage 2: attention per (batch, head-group, q-tile) -----
    G = _pick_head_group(num_heads, hd)        # lane width G*hd multiple of 128
    GD = G * hd
    n_groups = num_heads // G

    tq = _pick_tile(N, 256 if cap <= (64 << 20) else 512, 8)

    def _attn_step_bytes(t):
        b = (2 * t * GD + 2 * N * GD) * itemsize        # q, ctx, k, v blocks
        b += G * t * N * probs_itemsize                 # probs block
        b += 3 * t * N * 4                              # f32 score/exp temporaries
        if has_mask:
            b += t * N                                  # int8 mask block
        return b

    ceiling = max(cap - (16 << 20), 8 << 20)
    while tq >= 16 and 3 * _attn_step_bytes(tq) > ceiling and (tq // 2) % 8 == 0:
        tq //= 2                                        # still divides N

    q_spec = pl.BlockSpec((1, tq, GD), lambda b, g, qi: (b, qi, g))
    kv_spec = pl.BlockSpec((1, N, GD), lambda b, g, qi: (b, 0, g))   # resident over qi
    in_specs = [q_spec, kv_spec, kv_spec]
    args = [q, k, v]
    if has_mask:
        in_specs.append(pl.BlockSpec((1, 1, tq, N), lambda b, g, qi: (b, 0, qi, 0)))
        args.append(mask_i8)

    probs_spec = pl.BlockSpec((1, G, tq, N), lambda b, g, qi: (b, g, qi, 0))
    ctx_spec = pl.BlockSpec((1, tq, GD), lambda b, g, qi: (b, qi, g))

    attn_bytes = 4 * B * N * E * itemsize + B * num_heads * N * N * probs_itemsize
    if has_mask:
        attn_bytes += B * n_groups * N * N              # int8 mask re-fetch per group

    probs, ctx = pl.pallas_call(
        functools.partial(_attention_kernel, G, hd, has_mask),
        out_shape=(jax.ShapeDtypeStruct((B, num_heads, N, N), probs_dtype),
                   jax.ShapeDtypeStruct((B, N, E), dtype)),
        grid=(B, n_groups, N // tq),
        in_specs=in_specs,
        out_specs=(probs_spec, ctx_spec),
        compiler_params=pltpu.CompilerParams(
            dimension_semantics=("parallel", "parallel", "parallel"),
            vmem_limit_bytes=_vmem_budget(_attn_step_bytes(tq), cap)),
        cost_estimate=pl.CostEstimate(
            flops=4 * B * num_heads * N * N * hd,
            transcendentals=B * num_heads * N * (N + 1),
            bytes_accessed=int(attn_bytes)),
    )(*args)

    # ---------------- stage 3: output projection (full-depth matmul) ---------
    tn3 = _pick_tile(N, 256, 8)
    te3 = _pick_tile(E, 512, 128)
    oproj_block_bytes = tn3 * E * itemsize + (E * te3 + te3) * w_itemsize \
        + tn3 * te3 * (itemsize + 4)

    out = pl.pallas_call(
        _out_proj_kernel,
        out_shape=jax.ShapeDtypeStruct((B, N, E), dtype),
        grid=(B, N // tn3, E // te3),
        in_specs=[pl.BlockSpec((1, tn3, E), lambda b, ni, ei: (b, ni, 0)),
                  pl.BlockSpec((E, te3), lambda b, ni, ei: (0, ei)),
                  pl.BlockSpec((1, te3), lambda b, ni, ei: (0, ei))],
        out_specs=pl.BlockSpec((1, tn3, te3), lambda b, ni, ei: (b, ni, ei)),
        compiler_params=pltpu.CompilerParams(
            dimension_semantics=("parallel", "parallel", "parallel"),
            vmem_limit_bytes=_vmem_budget(oproj_block_bytes, cap)),
        cost_estimate=pl.CostEstimate(
            flops=2 * B * N * E * E, transcendentals=0,
            bytes_accessed=int(2 * B * N * E * itemsize
                               + B * (N // tn3) * (E * E + E) * w_itemsize)),
    )(ctx, wo, bo)

    return out, probs


# -----------------------------------------------------------------------------
# Pure-JAX reference mirroring the PyTorch forward exactly.
# -----------------------------------------------------------------------------
def ref_mha(x_q, x_k, x_v, params, num_heads, mask=None):
    wq, bq, wk, bk, wv, bv, wo, bo = params
    B, N, E = x_q.shape
    hd = E // num_heads
    q = x_q @ wq + bq
    k = x_k @ wk + bk
    v = x_v @ wv + bv
    q = q.reshape(B, N, num_heads, hd).transpose(0, 2, 1, 3)
    k = k.reshape(B, N, num_heads, hd).transpose(0, 2, 1, 3)
    v = v.reshape(B, N, num_heads, hd).transpose(0, 2, 1, 3)
    scores = jnp.einsum("bhnd,bhmd->bhnm", q, k) / math.sqrt(hd)
    if mask is not None:
        scores = jnp.where(mask == 0, FP16_MIN, scores)
    scores = jnp.where(jnp.isneginf(scores), FP16_MIN, scores)
    scores = jnp.where(jnp.isposinf(scores), FP16_MAX, scores)
    probs = jax.nn.softmax(scores, axis=-1)
    ctx = jnp.einsum("bhnm,bhmd->bhnd", probs, v)
    ctx = ctx.transpose(0, 2, 1, 3).reshape(B, N, E)
    out = ctx @ wo + bo
    return out, probs


if __name__ == "__main__":
    B, N, E, H = 2, 8, 32, 4

    key = jax.random.PRNGKey(0)
    keys = jax.random.split(key, 12)
    scale = 1.0 / math.sqrt(E)

    # Deterministic synthetic parameters (weights stored as [E_in, E_out]).
    wq = jax.random.uniform(keys[0], (E, E), jnp.float32, -scale, scale)
    bq = jax.random.uniform(keys[1], (1, E), jnp.float32, -scale, scale)
    wk = jax.random.uniform(keys[2], (E, E), jnp.float32, -scale, scale)
    bk = jax.random.uniform(keys[3], (1, E), jnp.float32, -scale, scale)
    wv = jax.random.uniform(keys[4], (E, E), jnp.float32, -scale, scale)
    bv = jax.random.uniform(keys[5], (1, E), jnp.float32, -scale, scale)
    wo = jax.random.uniform(keys[6], (E, E), jnp.float32, -scale, scale)
    bo = jax.random.uniform(keys[7], (1, E), jnp.float32, -scale, scale)
    params = (wq, bq, wk, bk, wv, bv, wo, bo)

    x_q = jax.random.normal(keys[8], (B, N, E), jnp.float32)
    x_k = jax.random.normal(keys[9], (B, N, E), jnp.float32)
    x_v = jax.random.normal(keys[10], (B, N, E), jnp.float32)

    # Tolerance relaxed slightly: softmax denominator uses the EUP approximate
    # reciprocal (relative error ~1e-4).
    ATOL = RTOL = 2e-3

    # --- no mask -------------------------------------------------------------
    out, probs = multi_head_attention(x_q, x_k, x_v, params, H, mask=None)
    jax.block_until_ready((out, probs))
    out_ref, probs_ref = ref_mha(x_q, x_k, x_v, params, H, mask=None)
    assert out.shape == (B, N, E) and probs.shape == (B, H, N, N)
    assert jnp.allclose(out, out_ref, atol=ATOL, rtol=RTOL)
    assert jnp.allclose(probs, probs_ref, atol=ATOL, rtol=RTOL)

    # --- causal mask [B, 1, N, N] --------------------------------------------
    causal = jnp.tril(jnp.ones((N, N), jnp.float32))
    mask = jnp.tile(causal[None, None], (B, 1, 1, 1))
    out_m, probs_m = multi_head_attention(x_q, x_k, x_v, params, H, mask=mask)
    jax.block_until_ready((out_m, probs_m))
    out_mr, probs_mr = ref_mha(x_q, x_k, x_v, params, H, mask=mask)
    assert jnp.allclose(out_m, out_mr, atol=ATOL, rtol=RTOL)
    assert jnp.allclose(probs_m, probs_mr, atol=ATOL, rtol=RTOL)

    print("KERNEL_OK")
</pallas_src>

<mosaic_0001>
module attributes {stable_mosaic.version = 11 : i64} {
  func.func @_qkv_proj_kernel(%arg0: i32, %arg1: i32, %arg2: i32, %arg3: memref<1x8x32xf32, #tpu.memory_space<vmem>>, %arg4: memref<1x8x32xf32, #tpu.memory_space<vmem>>, %arg5: memref<1x8x32xf32, #tpu.memory_space<vmem>>, %arg6: memref<32x32xf32, #tpu.memory_space<vmem>>, %arg7: memref<1x32xf32, #tpu.memory_space<vmem>>, %arg8: memref<32x32xf32, #tpu.memory_space<vmem>>, %arg9: memref<1x32xf32, #tpu.memory_space<vmem>>, %arg10: memref<32x32xf32, #tpu.memory_space<vmem>>, %arg11: memref<1x32xf32, #tpu.memory_space<vmem>>, %arg12: memref<1x8x32xf32, #tpu.memory_space<vmem>>, %arg13: memref<1x8x32xf32, #tpu.memory_space<vmem>>, %arg14: memref<1x8x32xf32, #tpu.memory_space<vmem>>) attributes {dimension_semantics = [#tpu.dimension_semantics<parallel>, #tpu.dimension_semantics<parallel>, #tpu.dimension_semantics<parallel>], iteration_bounds = array<i64: 2, 1, 1>, scalar_prefetch = 0 : i64, scratch_operands = 0 : i64, tpu.core_type = #tpu.core_type<tc>, window_params = [{transform_indices = @transform_0, window_bounds = array<i64: 1, 8, 32>}, {transform_indices = @transform_1, window_bounds = array<i64: 1, 8, 32>}, {transform_indices = @transform_2, window_bounds = array<i64: 1, 8, 32>}, {transform_indices = @transform_3, window_bounds = array<i64: 32, 32>}, {transform_indices = @transform_4, window_bounds = array<i64: 1, 32>}, {transform_indices = @transform_5, window_bounds = array<i64: 32, 32>}, {transform_indices = @transform_6, window_bounds = array<i64: 1, 32>}, {transform_indices = @transform_7, window_bounds = array<i64: 32, 32>}, {transform_indices = @transform_8, window_bounds = array<i64: 1, 32>}, {transform_indices = @transform_9, window_bounds = array<i64: 1, 8, 32>}, {transform_indices = @transform_10, window_bounds = array<i64: 1, 8, 32>}, {transform_indices = @transform_11, window_bounds = array<i64: 1, 8, 32>}]} {
    %c0 = arith.constant 0 : index
    %c0_0 = arith.constant 0 : index
    %c0_1 = arith.constant 0 : index
    %0 = vector.load %arg3[%c0, %c0_0, %c0_1] : memref<1x8x32xf32, #tpu.memory_space<vmem>>, vector<1x8x32xf32>
    %1 = vector.shape_cast %0 : vector<1x8x32xf32> to vector<8x32xf32>
    %c0_2 = arith.constant 0 : index
    %c0_3 = arith.constant 0 : index
    %c0_4 = arith.constant 0 : index
    %2 = vector.load %arg4[%c0_2, %c0_3, %c0_4] : memref<1x8x32xf32, #tpu.memory_space<vmem>>, vector<1x8x32xf32>
    %3 = vector.shape_cast %2 : vector<1x8x32xf32> to vector<8x32xf32>
    %c0_5 = arith.constant 0 : index
    %c0_6 = arith.constant 0 : index
    %c0_7 = arith.constant 0 : index
    %4 = vector.load %arg5[%c0_5, %c0_6, %c0_7] : memref<1x8x32xf32, #tpu.memory_space<vmem>>, vector<1x8x32xf32>
    %5 = vector.shape_cast %4 : vector<1x8x32xf32> to vector<8x32xf32>
    %c0_8 = arith.constant 0 : index
    %c0_9 = arith.constant 0 : index
    %6 = vector.load %arg6[%c0_8, %c0_9] : memref<32x32xf32, #tpu.memory_space<vmem>>, vector<32x32xf32>
    %cst = arith.constant dense<0.000000e+00> : vector<8x32xf32>
    %7 = tpu.matmul %1, %6, %cst {dimension_numbers = #tpu.dot_dimension_numbers<[1], [0], [0], [1], [0, 0, 1, 1], [], []>} : vector<8x32xf32>, vector<32x32xf32>, vector<8x32xf32> -> vector<8x32xf32>
    %c0_10 = arith.constant 0 : index
    %c0_11 = arith.constant 0 : index
    %8 = vector.load %arg7[%c0_10, %c0_11] : memref<1x32xf32, #tpu.memory_space<vmem>>, vector<1x32xf32>
    %9 = vector.broadcast %8 : vector<1x32xf32> to vector<8x32xf32>
    %10 = arith.addf %7, %9 : vector<8x32xf32>
    %c0_12 = arith.constant 0 : index
    %c0_13 = arith.constant 0 : index
    %11 = vector.load %arg8[%c0_12, %c0_13] : memref<32x32xf32, #tpu.memory_space<vmem>>, vector<32x32xf32>
    %cst_14 = arith.constant dense<0.000000e+00> : vector<8x32xf32>
    %12 = tpu.matmul %3, %11, %cst_14 {dimension_numbers = #tpu.dot_dimension_numbers<[1], [0], [0], [1], [0, 0, 1, 1], [], []>} : vector<8x32xf32>, vector<32x32xf32>, vector<8x32xf32> -> vector<8x32xf32>
    %c0_15 = arith.constant 0 : index
    %c0_16 = arith.constant 0 : index
    %13 = vector.load %arg9[%c0_15, %c0_16] : memref<1x32xf32, #tpu.memory_space<vmem>>, vector<1x32xf32>
    %14 = vector.broadcast %13 : vector<1x32xf32> to vector<8x32xf32>
    %15 = arith.addf %12, %14 : vector<8x32xf32>
    %c0_17 = arith.constant 0 : index
    %c0_18 = arith.constant 0 : index
    %16 = vector.load %arg10[%c0_17, %c0_18] : memref<32x32xf32, #tpu.memory_space<vmem>>, vector<32x32xf32>
    %cst_19 = arith.constant dense<0.000000e+00> : vector<8x32xf32>
    %17 = tpu.matmul %5, %16, %cst_19 {dimension_numbers = #tpu.dot_dimension_numbers<[1], [0], [0], [1], [0, 0, 1, 1], [], []>} : vector<8x32xf32>, vector<32x32xf32>, vector<8x32xf32> -> vector<8x32xf32>
    %c0_20 = arith.constant 0 : index
    %c0_21 = arith.constant 0 : index
    %18 = vector.load %arg11[%c0_20, %c0_21] : memref<1x32xf32, #tpu.memory_space<vmem>>, vector<1x32xf32>
    %19 = vector.broadcast %18 : vector<1x32xf32> to vector<8x32xf32>
    %20 = arith.addf %17, %19 : vector<8x32xf32>
    %cst_22 = arith.constant 0.353553385 : f32
    %21 = vector.broadcast %cst_22 : f32 to vector<8x32xf32>
    %22 = arith.mulf %10, %21 : vector<8x32xf32>
    %c0_23 = arith.constant 0 : index
    %c0_24 = arith.constant 0 : index
    %c0_25 = arith.constant 0 : index
    %23 = vector.load %arg12[%c0_23, %c0_24, %c0_25] : memref<1x8x32xf32, #tpu.memory_space<vmem>>, vector<1x8x32xf32>
    %24 = vector.shape_cast %23 : vector<1x8x32xf32> to vector<8x32xf32>
    %25 = vector.shape_cast %22 : vector<8x32xf32> to vector<1x8x32xf32>
    tpu.vector_store %arg12[%c0_23, %c0_24, %c0_25], %25 {strides = array<i32>} : memref<1x8x32xf32, #tpu.memory_space<vmem>>, vector<1x8x32xf32>,
    %c0_26 = arith.constant 0 : index
    %c0_27 = arith.constant 0 : index
    %c0_28 = arith.constant 0 : index
    %26 = vector.load %arg13[%c0_26, %c0_27, %c0_28] : memref<1x8x32xf32, #tpu.memory_space<vmem>>, vector<1x8x32xf32>
    %27 = vector.shape_cast %26 : vector<1x8x32xf32> to vector<8x32xf32>
    %28 = vector.shape_cast %15 : vector<8x32xf32> to vector<1x8x32xf32>
    tpu.vector_store %arg13[%c0_26, %c0_27, %c0_28], %28 {strides = array<i32>} : memref<1x8x32xf32, #tpu.memory_space<vmem>>, vector<1x8x32xf32>,
    %c0_29 = arith.constant 0 : index
    %c0_30 = arith.constant 0 : index
    %c0_31 = arith.constant 0 : index
    %29 = vector.load %arg14[%c0_29, %c0_30, %c0_31] : memref<1x8x32xf32, #tpu.memory_space<vmem>>, vector<1x8x32xf32>
    %30 = vector.shape_cast %29 : vector<1x8x32xf32> to vector<8x32xf32>
    %31 = vector.shape_cast %20 : vector<8x32xf32> to vector<1x8x32xf32>
    tpu.vector_store %arg14[%c0_29, %c0_30, %c0_31], %31 {strides = array<i32>} : memref<1x8x32xf32, #tpu.memory_space<vmem>>, vector<1x8x32xf32>,
    return
  }
  func.func @transform_0(%arg0: i32, %arg1: i32, %arg2: i32) -> (i32, i32, i32) {
    %c0_i32 = arith.constant 0 : i32
    %c0_i32_0 = arith.constant 0 : i32
    return %arg0, %arg1, %c0_i32 : i32, i32, i32
  }
  func.func @transform_1(%arg0: i32, %arg1: i32, %arg2: i32) -> (i32, i32, i32) {
    %c0_i32 = arith.constant 0 : i32
    %c0_i32_0 = arith.constant 0 : i32
    return %arg0, %arg1, %c0_i32 : i32, i32, i32
  }
  func.func @transform_2(%arg0: i32, %arg1: i32, %arg2: i32) -> (i32, i32, i32) {
    %c0_i32 = arith.constant 0 : i32
    %c0_i32_0 = arith.constant 0 : i32
    return %arg0, %arg1, %c0_i32 : i32, i32, i32
  }
  func.func @transform_3(%arg0: i32, %arg1: i32, %arg2: i32) -> (i32, i32) {
    %c0_i32 = arith.constant 0 : i32
    %c0_i32_0 = arith.constant 0 : i32
    return %c0_i32, %arg2 : i32, i32
  }
  func.func @transform_4(%arg0: i32, %arg1: i32, %arg2: i32) -> (i32, i32) {
    %c0_i32 = arith.constant 0 : i32
    %c0_i32_0 = arith.constant 0 : i32
    return %c0_i32, %arg2 : i32, i32
  }
  func.func @transform_5(%arg0: i32, %arg1: i32, %arg2: i32) -> (i32, i32) {
    %c0_i32 = arith.constant 0 : i32
    %c0_i32_0 = arith.constant 0 : i32
    return %c0_i32, %arg2 : i32, i32
  }
  func.func @transform_6(%arg0: i32, %arg1: i32, %arg2: i32) -> (i32, i32) {
    %c0_i32 = arith.constant 0 : i32
    %c0_i32_0 = arith.constant 0 : i32
    return %c0_i32, %arg2 : i32, i32
  }
  func.func @transform_7(%arg0: i32, %arg1: i32, %arg2: i32) -> (i32, i32) {
    %c0_i32 = arith.constant 0 : i32
    %c0_i32_0 = arith.constant 0 : i32
    return %c0_i32, %arg2 : i32, i32
  }
  func.func @transform_8(%arg0: i32, %arg1: i32, %arg2: i32) -> (i32, i32) {
    %c0_i32 = arith.constant 0 : i32
    %c0_i32_0 = arith.constant 0 : i32
    return %c0_i32, %arg2 : i32, i32
  }
  func.func @transform_9(%arg0: i32, %arg1: i32, %arg2: i32) -> (i32, i32, i32) {
    %c0_i32 = arith.constant 0 : i32
    return %arg0, %arg1, %arg2 : i32, i32, i32
  }
  func.func @transform_10(%arg0: i32, %arg1: i32, %arg2: i32) -> (i32, i32, i32) {
    %c0_i32 = arith.constant 0 : i32
    return %arg0, %arg1, %arg2 : i32, i32, i32
  }
  func.func @transform_11(%arg0: i32, %arg1: i32, %arg2: i32) -> (i32, i32, i32) {
    %c0_i32 = arith.constant 0 : i32
    return %arg0, %arg1, %arg2 : i32, i32, i32
  }
}

</mosaic_0001>

<bundles_post_ra>
// kernel: tpu_custom_call.1
= control target key start
LH: loop header
LB: loop body
LE: loop exit
PB: predicated region body
PF: predicated region fallthrough
CT: control target
= control target key end

     0   :  { %s2151_s0 = inlined_call_operand.hbm [shape: f32[2,8,32], index: 0, kind: input, shape index: {}]   ;;  %s2152_s1 = inlined_call_operand.hbm [shape: f32[2,8,32], index: 1, kind: input, shape index: {}]   ;;  %s2153_s2 = inlined_call_operand.hbm [shape: f32[2,8,32], index: 2, kind: input, shape index: {}]   ;;  %s2154_s3 = inlined_call_operand.hbm [shape: f32[32,32], index: 3, kind: input, shape index: {}]   ;;  %s2155_s4 = inlined_call_operand.vmem [shape: f32[1,32], index: 4, kind: input, shape index: {}]   ;;  %s2156_s5 = inlined_call_operand.hbm [shape: f32[32,32], index: 5, kind: input, shape index: {}]   ;;  %s2157_s6 = inlined_call_operand.vmem [shape: f32[1,32], index: 6, kind: input, shape index: {}]   ;;  %s2158_s7 = inlined_call_operand.hbm [shape: f32[32,32], index: 7, kind: input, shape index: {}]   ;;  %s2159_s8 = inlined_call_operand.vmem [shape: f32[1,32], index: 8, kind: input, shape index: {}]   ;;  %s2160_s9 = inlined_call_operand.hbm [shape: f32[2,8,32], index: 9, kind: output, shape index: {0}]   ;;  %s2161_s10 = inlined_call_operand.hbm [shape: f32[2,8,32], index: 10, kind: output, shape index: {1}]   ;;  %s2162_s11 = inlined_call_operand.hbm [shape: f32[2,8,32], index: 11, kind: output, shape index: {2}]  }
   0x1   :  { %2183 = sst [smem:[#allocation29_spill]] %s2152_s1 }
   0x2   :  { %2184 = sst [smem:[#allocation30_spill]] %s2154_s3 }
   0x3   :  { %2185 = sst [smem:[#allocation31_spill]] %s2156_s5 }
   0x4   :  { %2186 = sst [smem:[#allocation32_spill]] %s2159_s8 }
   0x5   :  { %2187 = sst [smem:[#allocation33_spill]] %s2160_s9 }
   0x6   :  { %2188 = sst [smem:[#allocation34_spill]] %s2162_s11 }
   0x7   :  { %17 = vsyncpa [#allocation3], 0 }
   0x8   :  { %19 = vsyncpa [#allocation3 + $0x1], 0 }
   0x9   :  { %20 = vsyncpa [#allocation6], 0 }
   0xa   :  { %22 = vsyncpa [#allocation6 + $0x1], 0 }
   0xb   :  { %23 = vsyncpa [#allocation9], 0 }
   0xc   :  { %24 = vsyncpa [#allocation12], 0 }
   0xd   :  { %25 = vsyncpa [#allocation4], 0 }
   0xe   :  { %27 = vsyncpa [#allocation4 + $0x1], 0 }
   0xf   :  { %28 = vsyncpa [#allocation15], 0 }
  0x10   :  { %30 = vsyncpa [#allocation15 + $0x1], 0  ;;  %s1809_s17 = smov 0   ;;  %s1811_s18 = smov 0  }
  0x11   :  { %s1813_s19 = smov 0   ;;  %s1815_s20 = smov 0  }
  0x12   :  { %s1817_s21 = smov 0   ;;  %s1819_s22 = smov 0  }
  0x13 LB: > { %2189 = sst [smem:[#allocation23_spill]] %s1714_s17  ;;  %s1840_s23 = sadd.s32 4294967295, %s1734_s22   ;;  %s1734_s22 = sphi %s1819_s22, %s36_s22   ;;  %s1730_s21 = sphi %s1817_s21, %s2231_s21   ;;  %s1726_s20 = sphi %s1815_s20, %s2230_s20   ;;  %s1722_s19 = sphi %s1813_s19, %s2234_s19   ;;  %s1718_s18 = sphi %s1811_s18, %s2233_s18   ;;  %s1714_s17 = sphi %s1809_s17, %s2232_s17  }
  0x14   : > { %2190 = sst [smem:[#allocation24_spill]] %s1730_s21  ;;  %s2163_s24 = sadd.s32 4294967294, %s1734_s22  }
  0x15   : > { %2191 = sst [smem:[#allocation25_spill]] %s1734_s22  ;;  %p77_p0 = scmp.ne.s32.totalorder %s1718_s18, %s1714_s17 }
  0x16   : > { %p2177_p1 = scmp.eq.s32.totalorder %s1840_s23, 0  ;;  %p323_p3 = scmp.eq.s32.totalorder %s2163_s24, 1 }
  0x17   : > { %p1221_p5 = scmp.ge.s32.totalorder %s1734_s22, 1  ;;  %p390_p7 = scmp.lt.s32.totalorder %s1734_s22, 3 }
  0x18   : > { %p1851_p4 = por %p2177_p1, %p77_p0  ;;  %p1856_p6 = por %p323_p3, %p77_p0 }
  0x19   : > { %p1861_p8 = pnand %p1221_p5, %p390_p7  ;;  %s1736_s28 = smov [#allocation8]  }
  0x1a   : > { %s2192_s25 = scalar_select %p1851_p4, 1, 0 }
  0x1b   : > { %s2193_s26 = scalar_select %p1856_p6, 1, 0 }
  0x1c   : > { %s2195_s27 = scalar_select %p1861_p8, 1, 0 }
  0x1d   : > { %2194 = sst [smem:[#allocation26_spill]] %s2193_s26  ;;  %s404_s29 = sshll.u32 %s1736_s28, 4  ;;  %s405_s29 = int_to_ptr.vmem [resolvable:$true] %s404_s29 }
  0x1e   : > { %p1331_p9 = pneg %p1861_p8  ;;  %s55_s12 = sadd.s32 1, %s1730_s21 }
  0x1f   : > { %s1435_s13 = scalar_lea.vmem %s405_s29, 512  ;;  %p1443_p5 = scmp.lt.s32.totalorder %s405_s29, %s405_s29 }
  0x20   : > { %p1870_p11 = pnand %p1331_p9, %p2177_p1  ;;  %p1436_p13 = scmp.ne.s32.totalorder %s405_s29, %s1435_s13 }
  0x21   : > { %p1444_p7 = scmp.lt.s32.totalorder %s1435_s13, %s1435_s13 }
  0x22   : > { %p2178_p12 = pneg %p1870_p11 }
  0x23   : > { %p1445_p2 = por %p1444_p7, %p1443_p5 }
  0x24   : > { %p1438_p0 = pnand %p1436_p13, %p2178_p12 }
  0x26   : > { %p1439_p3 = pneg %p1438_p0 }
  0x28   : > { %p1446_p10 = pnand %p1445_p2, %p1439_p3 }
  0x2a   : > { %1449 = shalt.err (!%p1446_p10)
}
  0x2b   : > { %s2166_s14 = smov 128   ;;  %s2168_s15 = smov 8  }
  0x2c   : > { %s2197_s3 = sld [smem:[#allocation30_spill]]  ;;  %p57_p2 = scmp.ge.s32.totalorder %s55_s12, 2 }
  0x2d   : > { %s64_s13 = sadd.s32 1, %s1722_s19  ;;  %p71_p9 = scmp.ne.s32.totalorder %s1722_s19, %s1718_s18 }
  0x2e   : > { %p72_p10 = scmp.eq.s32.totalorder %s1734_s22, 0  ;;  %s2236_s12 = smov (%p57_p2, %s55_s12), 0 }
  0x2f   : > { %2198 = sst [smem:[#allocation27_spill]] %s2236_s12  ;;  %p2199_p0 = scmp.eq.s32.totalorder %s1840_s23, 1 }
  0x30   : > { %p73_p13 = por %p72_p10, %p71_p9  ;;  %s59_s26 = ssub.s32 %s1730_s21, %s2236_s12 }
  0x31   : > { %p1896_p3 = por %p2199_p0, %p71_p9  ;;  %p1364_p5 = scmp.lt.s32.totalorder %s1734_s22, 2 }
  0x32   : > { %1334 = dma.hbm_to_vmem [thread:$0]  (!%p1870_p11), %s2197_s3, 512, %s405_s29, [#allocation9], %s2166_s14, %s2166_s14, %s2168_s15  }
  0x33   : > { %s2200_s24 = scalar_select %p1896_p3, 1, 0 }
  0x34   : > { %p62_p7 = scmp.eq.s32.totalorder %s59_s26, 0  ;;  %s2172_s17 = sand.u32 1, %s1722_s19  }
  0x35   : > { %s1906_s29 = sshll.u32 %s2172_s17, 3  ;;  %s1909_s16 = sshll.u32 %s1730_s21, 7 }
  0x36   : > { %s1912_s28 = scalar_select %p62_p7, %s1722_s19, %s64_s13  }
  0x37   : > { %p1914_p2 = pnand %p1364_p5, %p73_p13  ;;  %s485_s15 = sand.u32 1, %s1734_s22  }
  0x38   : > { %2201 = sst [smem:[#allocation28_spill]] %s1912_s28  ;;  %s489_s11 = scalar_lea.vmem [#allocation5], %s1906_s29 }
  0x39   : > { %s2203_s1 = sld [smem:[#allocation29_spill]]  ;;  %s497_s17 = sshll.u32 %s489_s11, 4  ;;  %s498_s17 = int_to_ptr.vmem [resolvable:$true] %s497_s17 }
  0x3a   : > { %s1739_s8 = smov [#allocation10]   ;;  %s1924_s9 = scalar_lea.sflag [#allocation6], %s485_s15 }
  0x3b   : > { %s425_s21 = sshll.u32 %s1739_s8, 4  ;;  %p2179_p9 = pneg %p1914_p2  ;;  %s426_s21 = int_to_ptr.vmem [resolvable:$true] %s425_s21 }
  0x3c   : > { %s1463_s13 = scalar_lea.vmem %s498_s17, 128  ;;  %s1740_s28 = smov [#allocation5]  }
  0x3d   : > { %p1464_p10 = scmp.ne.s32.totalorder %s498_s17, %s1463_s13  ;;  %s1468_s22 = sshll.u32 %s1740_s28, 4  ;;  %s1469_s22 = int_to_ptr.vmem [resolvable:$false] %s1468_s22 }
  0x3e   : > { %s1470_s3 = scalar_lea.vmem %s1469_s22, 256  ;;  %p1471_p5 = scmp.lt.s32.totalorder %s498_s17, %s1469_s22 }
  0x3f   : > { %s495_s26 = scalar_lea.hbm %s2203_s1, %s1909_s16  ;;  %p1466_p13 = pnand %p1464_p10, %p2179_p9 }
  0x40   : > { %p1472_p7 = scmp.lt.s32.totalorder %s1470_s3, %s1463_s13 }
  0x41   : > { %p1467_p0 = pneg %p1466_p13 }
  0x42   : > { %p1473_p1 = por %p1472_p7, %p1471_p5 }
  0x44   : > { %p1474_p12 = pnand %p1473_p1, %p1467_p0 }
  0x46   : > { %1477 = shalt.err (!%p1474_p12)
}
  0x47   : > { %1347 = dma.hbm_to_vmem [thread:$0]  (!%p1914_p2), %s495_s26, 128, %s498_s17, %s1924_s9  }
  0x48   : > { %s1489_s8 = scalar_lea.vmem %s426_s21, 512  ;;  %p2204_p10 = pneg %p1870_p11 }
  0x49   : > { %p1490_p6 = scmp.ne.s32.totalorder %s426_s21, %s1489_s8  ;;  %p1497_p3 = scmp.lt.s32.totalorder %s426_s21, %s426_s21 }
  0x4a   : > { %p1498_p4 = scmp.lt.s32.totalorder %s1489_s8, %s1489_s8 }
  0x4b   : > { %p1492_p13 = pnand %p1490_p6, %p2204_p10 }
  0x4c   : > { %p1499_p8 = por %p1498_p4, %p1497_p3 }
  0x4d   : > { %p1493_p9 = pneg %p1492_p13 }
  0x4f   : > { %p1500_p5 = pnand %p1499_p8, %p1493_p9 }
  0x51   : > { %1503 = shalt.err (!%p1500_p5)
}
  0x52   : > { %s2205_s11 = smov 8   ;;  %s2206_s22 = smov 128  }
  0x53   : > { %s2207_s5 = sld [smem:[#allocation31_spill]]  ;;  %s1741_s17 = smov [#allocation11]  }
  0x54   : > { %s446_s28 = sshll.u32 %s1741_s17, 4  ;;  %p2208_p6 = pmov %p2204_p10  ;;  %s447_s28 = int_to_ptr.vmem [resolvable:$true] %s446_s28 }
  0x55   : > { %s1515_s26 = scalar_lea.vmem %s447_s28, 512  ;;  %p1523_p12 = scmp.lt.s32.totalorder %s447_s28, %s447_s28 }
  0x56   : > { %p1516_p1 = scmp.ne.s32.totalorder %s447_s28, %s1515_s26  ;;  %p1524_p3 = scmp.lt.s32.totalorder %s1515_s26, %s1515_s26 }
  0x58   : > { %p1518_p4 = pnand %p1516_p1, %p2208_p6  ;;  %p1525_p9 = por %p1524_p3, %p1523_p12 }
  0x59   : > { %1337 = dma.hbm_to_vmem [thread:$0]  (!%p1870_p11), %s2207_s5, 512, %s426_s21, [#allocation9], %s2206_s22, %s2206_s22, %s2205_s11  }
  0x5a   : > { %p1519_p8 = pneg %p1518_p4 }
  0x5c   : > { %p1526_p0 = pnand %p1525_p9, %p1519_p8 }
  0x5e   : > { %1529 = shalt.err (!%p1526_p0)
}
  0x5f   : > { %1340 = dma.hbm_to_vmem [thread:$0]  (!%p1870_p11), %s2158_s7, 512, %s447_s28, [#allocation12], %s2206_s22, %s2206_s22, %s2205_s11  }
  0x60   : > { %s476_s12 = scalar_lea.hbm %s2151_s0, %s1909_s16  ;;  %s470_s15 = scalar_lea.vmem [#allocation2], %s1906_s29 }
  0x61   : > { %s478_s17 = sshll.u32 %s470_s15, 4  ;;  %s2209_s26 = sand.u32 1, %s1722_s19   ;;  %s479_s17 = int_to_ptr.vmem [resolvable:$true] %s478_s17 }
  0x62   : > { %s467_s30 = scalar_lea.sflag [#allocation3], %s2209_s26  ;;  %s1543_s1 = scalar_lea.vmem %s479_s17, 128 }
  0x63   : > { %p1544_p7 = scmp.ne.s32.totalorder %s479_s17, %s1543_s1  ;;  %p2210_p10 = pneg %p1914_p2 }
  0x64   : > { %s1742_s21 = smov [#allocation2]  }
  0x65   : > { %p1546_p13 = pnand %p1544_p7, %p2210_p10  ;;  %s1548_s13 = sshll.u32 %s1742_s21, 4  ;;  %s1549_s13 = int_to_ptr.vmem [resolvable:$false] %s1548_s13 }
  0x66   : > { %s1550_s5 = scalar_lea.vmem %s1549_s13, 256  ;;  %p1551_p11 = scmp.lt.s32.totalorder %s479_s17, %s1549_s13 }
  0x67   : > { %p1547_p5 = pneg %p1546_p13  ;;  %p1552_p1 = scmp.lt.s32.totalorder %s1550_s5, %s1543_s1 }
  0x69   : > { %p1553_p6 = por %p1552_p1, %p1551_p11 }
  0x6b   : > { %p1554_p4 = pnand %p1553_p6, %p1547_p5 }
  0x6d   : > { %1557 = shalt.err (!%p1554_p4)
}
  0x6e   : > { %1344 = dma.hbm_to_vmem [thread:$0]  (!%p1914_p2), %s476_s12, 128, %s479_s17, %s467_s30  }
  0x6f   : > { %s514_s28 = scalar_lea.hbm %s2153_s2, %s1909_s16  ;;  %s508_s3 = scalar_lea.vmem [#allocation7], %s1906_s29 }
  0x70   : > { %s516_s8 = sshll.u32 %s508_s3, 4  ;;  %p2211_p12 = pmov %p2210_p10  ;;  %s517_s8 = int_to_ptr.vmem [resolvable:$true] %s516_s8 }
  0x71   : > { %s1571_s15 = scalar_lea.vmem %s517_s8, 128  ;;  %s1743_s1 = smov [#allocation7]  }
  0x72   : > { %p1572_p8 = scmp.ne.s32.totalorder %s517_s8, %s1571_s15  ;;  %s1576_s5 = sshll.u32 %s1743_s1, 4  ;;  %s1577_s5 = int_to_ptr.vmem [resolvable:$false] %s1576_s5 }
  0x73   : > { %s1578_s26 = scalar_lea.vmem %s1577_s5, 256  ;;  %p1579_p0 = scmp.lt.s32.totalorder %s517_s8, %s1577_s5 }
  0x74   : > { %p1574_p3 = pnand %p1572_p8, %p2211_p12  ;;  %p1580_p7 = scmp.lt.s32.totalorder %s1578_s26, %s1571_s15 }
  0x76   : > { %p1575_p9 = pneg %p1574_p3  ;;  %p1581_p10 = por %p1580_p7, %p1579_p0 }
  0x78   : > { %p1582_p13 = pnand %p1581_p10, %p1575_p9 }
  0x7a   : > { %1585 = shalt.err (!%p1582_p13)
}
  0x7b   : > { %1350 = dma.hbm_to_vmem [thread:$0]  (!%p1914_p2), %s514_s28, 128, %s517_s8, %s1924_s9  }
  0x7c   : > { %p2212_p5 = scmp.ne.s32.totalorder %s2195_s27, 0 }
  0x7d   : > { %s1982_s29 = sand.u32 (!%p2212_p5), 1, %s1718_s18   ;;  %p2213_p11 = scmp.ne.s32.totalorder (!%p2212_p5), %s2192_s25, 0 }
  0x7e   : > { %525 = sbr.rel (%p2212_p5) target bundleno = 412 (0x19c), region = 56  ;;  %s1985_s16 = sshll.u32 (!%p2212_p5), %s1982_s29, 3 }
  0x7f   : > { %s528_s12 = scalar_lea.sflag (!%p2212_p5), [#allocation3], %s1982_s29  ;;  %s531_s17 = scalar_lea.vmem (!%p2212_p5), [#allocation2], %s1985_s16 }
  0x83   : > { %1689 = dma.done.wait (%p2213_p11), %s528_s12, 128  }
  0x84   : > { %1691 = vsyncadd (%p2213_p11), %s528_s12, 4294967168  ;;  %s536_s9 = sand.u32 1, %s1840_s23   ;;  %s540_s14 = scalar_lea.vmem [#allocation5], %s1985_s16 }
  0x85   : > { %s537_s27 = scalar_lea.sflag [#allocation6], %s536_s9 }
  0x86   : > { %1693 = dma.done.wait (%p2213_p11), %s537_s27, 256  }
  0x87   : > { %1695 = vsyncadd (%p2213_p11), %s537_s27, 4294967040  ;;  %s549_s30 = scalar_lea.vmem [#allocation7], %s1985_s16  ;;  %p2214_p2 = scmp.eq.s32.totalorder %s1840_s23, 0 }
  0x89   : > { %1697 = dma.done.wait (%p2214_p2), [#allocation9], 1024   ;;  %p2215_p1 = pmov %p2214_p2 }
  0x8b   : > { %1699 = vsyncadd (%p2215_p1), [#allocation9], 4294966272  ;;  %p2216_p6 = pmov %p2215_p1 }
  0x8c   : > { %p2217_p4 = pmov %p2215_p1 }
  0x8d   : > { %1701 = dma.done.wait (%p2216_p6), [#allocation12], 512  }
  0x8e   : > { %1703 = vsyncadd (%p2217_p4), [#allocation12], 4294966784  ;;  %v1744_v0 = vmov 0.0   ;;  %vm1745_vm0 = vmmov 0   ;;  %v644_v1 = vld [vmem:[#allocation8 + $0x18] sm:$0xff]  ;;  %v643_v2 = vld [vmem:[#allocation8 + $0x10] sm:$0xff] }
  0x8f   : > { %1274 = vmatprep.subr.mxu0 %v1744_v0  ;;  %1285 = vmatprep.subr.mxu1 %v1744_v0  ;;  %v729_v3 = vld [vmem:[#allocation10 + $0x18] sm:$0xff]  ;;  %v642_v4 = vld [vmem:[#allocation8 + $0x8] sm:$0xff]  ;;  %v728_v5 = vld [vmem:[#allocation10 + $0x10] sm:$0xff]  ;;  %vm652_vm1 = vcmask 261120   ;;  %s2026_s13 = sshll.u32 %s1726_s20, 7  ;;  %s621_s28 = scalar_lea.vmem [#allocation14], %s1985_s16 }
  0x90   : > { %1282 = vmatprep.mubr.msk.f32.mxu0 %vm1745_vm0, %v1744_v0  ;;  %1293 = vmatprep.mubr.msk.f32.mxu1 %vm1745_vm0, %v1744_v0  ;;  %v727_v6 = vld [vmem:[#allocation10 + $0x8] sm:$0xff]  ;;  %v641_v7 = vld [vmem:[#allocation8] sm:$0xff]  ;;  %v638_v8 = vld [vmem:[%s531_s17] sm:$0xff]  ;;  %s939_s3 = sshll.u32 %s621_s28, 4  ;;  %s614_s8 = scalar_lea.vmem [#allocation13], %s1985_s16  ;;  %s2039_s3 = int_to_ptr.vmem [resolvable:$true] %s939_s3 }
  0x91   : > { %1275 = vmatpush3.msra.mxu0 %v644_v1  ;;  %1286 = vmatpush3.msra.mxu1 %v729_v3  ;;  %v813_v9 = vld [vmem:[#allocation11 + $0x18] sm:$0xff]  ;;  %v726_v10 = vld [vmem:[#allocation10] sm:$0xff]  ;;  %v812_v12 = vld [vmem:[#allocation11 + $0x10] sm:$0xff]  ;;  %s924_s15 = sshll.u32 %s614_s8, 4  ;;  %s2037_s5 = scalar_lea.hbm %s2161_s10, %s2026_s13  ;;  %s2047_s15 = int_to_ptr.vmem [resolvable:$true] %s924_s15 }
  0x92   : > { %1276 = vmatprep.subr.mxu0 %v1744_v0  ;;  %1287 = vmatprep.subr.mxu1 %v1744_v0  ;;  %v639_v11 = vld [vmem:[%s540_s14] sm:$0xff]  ;;  %v640_v15 = vld [vmem:[%s549_s30] sm:$0xff]  ;;  %s2218_s17 = sld [smem:[#allocation33_spill]]  ;;  %s628_s30 = scalar_lea.vmem [#allocation16], %s1985_s16 }
  0x93   : > { %1277 = vmatpush3.msra.mxu0 %v643_v2  ;;  %1288 = vmatpush3.msra.mxu1 %v728_v5  ;;  %v811_v13 = vld [vmem:[#allocation11 + $0x8] sm:$0xff]  ;;  %v810_v14 = vld [vmem:[#allocation11] sm:$0xff]  ;;  %v1245_v16 = vld [vmem:[%s2155_s4] ss:$0 sm:$0xff]  ;;  %s2054_s25 = sshll.u32 %s628_s30, 4  ;;  %s2220_s22 = sld [smem:[#allocation32_spill]]  ;;  %s955_s25 = int_to_ptr.vmem [resolvable:$true] %s2054_s25 }
  0x94   : > { %1278 = vmatprep.subr.mxu0 %v1744_v0  ;;  %1289 = vmatprep.subr.mxu1 %v1744_v0  ;;  %v1247_v18 = vld [vmem:[%s2157_s6] ss:$0 sm:$0xff]  ;;  %s2061_s1 = scalar_lea.sflag [#allocation15], %s536_s9  ;;  %s1586_s20 = scalar_lea.vmem %s2039_s3, 128 }
  0x95   : > { %1279 = vmatpush3.msra.mxu0 %v642_v4  ;;  %1290 = vmatpush3.msra.mxu1 %v727_v6  ;;  %p1587_p8 = scmp.ne.s32.totalorder %s2039_s3, %s1586_s20  ;;  %p2221_p12 = scmp.ne.s32.totalorder %s2200_s24, 0 }
  0x96   : > { %1280 = vmatprep.subr.mxu0 %v1744_v0  ;;  %1291 = vmatprep.subr.mxu1 %v1744_v0  ;;  %s1746_s26 = smov [#allocation14]  }
  0x97   : > { %1281 = vmatpush3.msra.mxu0 %v641_v7  ;;  %1292 = vmatpush3.msra.mxu1 %v726_v10  ;;  %p1588_p3 = pnand %p1587_p8, %p2221_p12 }
  0x98   : > { %1283 = vmatmul.mubr.msk.f32.vlgmr.msra.gmra.mxu0 %vm652_vm1, %v638_v8  ;;  %1296 = vmatprep.subr.mxu0 %v1744_v0  ;;  %s2219_s27 = smov %s2218_s17  ;;  %s2045_s14 = scalar_lea.hbm %s2218_s17, %s2026_s13 }
  0x99   : > { %1297 = vmatpush3.msra.mxu0 %v813_v9  ;;  %1294 = vmatmul.mubr.msk.f32.vlgmr.msra.gmra.mxu1 %vm652_vm1, %v639_v11  ;;  %v1249_v25 = vld [vmem:[%s2220_s22] ss:$0 sm:$0xff]  ;;  %p1589_p9 = pneg %p1588_p3 }
  0x9a   : > { %1298 = vmatprep.subr.mxu0 %v1744_v0  ;;  %1304 = vmatprep.mubr.msk.f32.mxu0 %vm1745_vm0, %v1744_v0 }
  0x9b   : > { %1299 = vmatpush3.msra.mxu0 %v812_v12 }
  0x9c   : > { %1300 = vmatprep.subr.mxu0 %v1744_v0 }
  0x9d   : > { %1301 = vmatpush3.msra.mxu0 %v811_v13 }
  0x9e   : > { %1302 = vmatprep.subr.mxu0 %v1744_v0 }
  0x9f   : > { %1303 = vmatpush3.msra.mxu0 %v810_v14 }
  0xa0   : > { %1305 = vmatmul.mubr.msk.f32.vlgmr.msra.gmra.mxu0 %vm652_vm1, %v640_v15 }
 0x158   : > { %v722_v17 = vpop.f32.mrf.mxu0 }
 0x159   : > { %v723_v19 = vadd.f32 %v1245_v16, %v722_v17  ;;  %v806_v21 = vpop.f32.mrf.mxu1 }
 0x15a   : > { %v1284_v20 = vpop.f32.mrf.mxu0  ;;  %v807_v23 = vadd.f32 %v1247_v18, %v806_v21 }
 0x15b   : > { %v894_v22 = vmul.f32 0.35355338, %v723_v19  ;;  %v1295_v24 = vpop.f32.mrf.mxu1 }
 0x15c   : > { %896 = vst.msk [vmem:[%s621_s28] sm:$0xff] %vm652_vm1, %v807_v23  ;;  %s1590_s28 = sshll.u32 %s1746_s26, 4  ;;  %s1591_s28 = int_to_ptr.vmem [resolvable:$false] %s1590_s28 }
 0x15d   : > { %895 = vst.msk [vmem:[%s614_s8] sm:$0xff] %vm652_vm1, %v894_v22  ;;  %s1592_s8 = scalar_lea.vmem %s1591_s28, 256  ;;  %p1593_p0 = scmp.lt.s32.totalorder %s2039_s3, %s1591_s28 }
 0x15e   : > { %p1594_p7 = scmp.lt.s32.totalorder %s1592_s8, %s1586_s20 }
 0x160   : > { %p1595_p10 = por %p1594_p7, %p1593_p0 }
 0x162   : > { %p1596_p13 = pnand %p1595_p10, %p1589_p9 }
 0x164   : > { %1599 = shalt.err (!%p1596_p13)
}
 0x165   : > { %s1600_s23 = scalar_lea.hbm %s2037_s5, 128  ;;  %s1604_s17 = scalar_lea.hbm %s2161_s10, 256 }
 0x166   : > { %p1601_p5 = scmp.ne.s32.totalorder %s2037_s5, %s1600_s23  ;;  %p1605_p1 = scmp.lt.s32.totalorder %s2037_s5, %s2161_s10 }
 0x167   : > { %p1606_p6 = scmp.lt.s32.totalorder %s1604_s17, %s1600_s23 }
 0x168   : > { %p1602_p11 = pnand %p1601_p5, %p2221_p12 }
 0x169   : > { %p1607_p4 = por %p1606_p6, %p1605_p1 }
 0x16a   : > { %p1603_p2 = pneg %p1602_p11 }
 0x16c   : > { %p1608_p8 = pnand %p1607_p4, %p1603_p2 }
 0x16e   : > { %1611 = shalt.err (!%p1608_p8)
}
 0x16f   : > { %1326 = dma.vmem_to_hbm [thread:$0]  (%p2221_p12), %s2039_s3, 128, %s2037_s5, %s2061_s1  }
 0x170   : > { %s899_s22 = scalar_lea.sflag [#allocation4], %s1982_s29  ;;  %s1612_s20 = scalar_lea.vmem %s2047_s15, 128 }
 0x171   : > { %p1613_p3 = scmp.ne.s32.totalorder %s2047_s15, %s1612_s20  ;;  %s1747_s26 = smov [#allocation13]  }
 0x172   : > { %s1616_s28 = sshll.u32 %s1747_s26, 4  ;;  %s1617_s28 = int_to_ptr.vmem [resolvable:$false] %s1616_s28 }
 0x173   : > { %p1614_p9 = pnand %p1613_p3, %p2221_p12  ;;  %s1618_s8 = scalar_lea.vmem %s1617_s28, 256 }
 0x174   : > { %p1619_p7 = scmp.lt.s32.totalorder %s2047_s15, %s1617_s28  ;;  %p1620_p10 = scmp.lt.s32.totalorder %s1618_s8, %s1612_s20 }
 0x175   : > { %p1615_p0 = pneg %p1614_p9 }
 0x176   : > { %p1621_p13 = por %p1620_p10, %p1619_p7 }
 0x178   : > { %p1622_p5 = pnand %p1621_p13, %p1615_p0 }
 0x17a   : > { %1625 = shalt.err (!%p1622_p5)
}
 0x17b   : > { %s1626_s3 = scalar_lea.hbm %s2045_s14, 128  ;;  %s1630_s23 = scalar_lea.hbm %s2219_s27, 256 }
 0x17c   : > { %p1627_p11 = scmp.ne.s32.totalorder %s2045_s14, %s1626_s3  ;;  %p1631_p6 = scmp.lt.s32.totalorder %s2045_s14, %s2219_s27 }
 0x17d   : > { %p1632_p4 = scmp.lt.s32.totalorder %s1630_s23, %s1626_s3 }
 0x17e   : > { %p1628_p2 = pnand %p1627_p11, %p2221_p12 }
 0x17f   : > { %p1633_p8 = por %p1632_p4, %p1631_p6 }
 0x180   : > { %p1629_p1 = pneg %p1628_p2 }
 0x182   : > { %p1634_p3 = pnand %p1633_p8, %p1629_p1 }
 0x184   : > { %1637 = shalt.err (!%p1634_p3)
}
 0x185   : > { %1325 = dma.vmem_to_hbm [thread:$0]  (%p2221_p12), %s2047_s15, 128, %s2045_s14, %s899_s22   ;;  %v890_v26 = vpop.f32.mrf.mxu0 }
 0x186   : > { %v891_v27 = vadd.f32 %v1249_v25, %v890_v26  ;;  %s2222_s11 = sld [smem:[#allocation34_spill]]  ;;  %s1638_s26 = scalar_lea.vmem %s955_s25, 128 }
 0x187   : > { %v1306_v28 = vpop.f32.mrf.mxu0  ;;  %p1639_p9 = scmp.ne.s32.totalorder %s955_s25, %s1638_s26  ;;  %s1748_s28 = smov [#allocation16]  }
 0x188   : > { %897 = vst.msk [vmem:[%s628_s30] sm:$0xff] %vm652_vm1, %v891_v27  ;;  %s1642_s8 = sshll.u32 %s1748_s28, 4  ;;  %s1643_s8 = int_to_ptr.vmem [resolvable:$false] %s1642_s8 }
 0x189   : > { %p1640_p0 = pnand %p1639_p9, %p2221_p12  ;;  %s1644_s15 = scalar_lea.vmem %s1643_s8, 256 }
 0x18a   : > { %p1645_p10 = scmp.lt.s32.totalorder %s955_s25, %s1643_s8  ;;  %p1646_p13 = scmp.lt.s32.totalorder %s1644_s15, %s1638_s26 }
 0x18b   : > { %p1641_p7 = pneg %p1640_p0 }
 0x18c   : > { %s952_s20 = scalar_lea.hbm %s2222_s11, %s2026_s13  ;;  %p1647_p5 = por %p1646_p13, %p1645_p10 }
 0x18e   : > { %p1648_p11 = pnand %p1647_p5, %p1641_p7 }
 0x190   : > { %1651 = shalt.err (!%p1648_p11)
}
 0x191   : > { %s1652_s13 = scalar_lea.hbm %s952_s20, 128  ;;  %s1656_s30 = scalar_lea.hbm %s2222_s11, 256 }
 0x192   : > { %p1653_p2 = scmp.ne.s32.totalorder %s952_s20, %s1652_s13  ;;  %p1657_p4 = scmp.lt.s32.totalorder %s952_s20, %s2222_s11 }
 0x193   : > { %p1658_p8 = scmp.lt.s32.totalorder %s1656_s30, %s1652_s13 }
 0x194   : > { %p1654_p1 = pnand %p1653_p2, %p2221_p12 }
 0x195   : > { %p1659_p3 = por %p1658_p8, %p1657_p4 }
 0x196   : > { %p1655_p6 = pneg %p1654_p1 }
 0x198   : > { %p1660_p9 = pnand %p1659_p3, %p1655_p6 }
 0x19a   : > { %1663 = shalt.err (!%p1660_p9)
}
 0x19b   : > { %1327 = dma.vmem_to_hbm [thread:$0]  (%p2221_p12), %s955_s25, 128, %s952_s20, %s2061_s1  }
 0x19c PF: > { %s2223_s29 = sld [smem:[#allocation23_spill]] }
 0x19d   : > { %s2224_s5 = sld [smem:[#allocation26_spill]] }
 0x19e   : > { %s2225_s23 = sld [smem:[#allocation25_spill]] }
 0x1a2   : > { %s966_s9 = sand.u32 1, %s2223_s29  }
 0x1a3   : > { %p2226_p0 = scmp.ne.s32.totalorder %s2224_s5, 0  ;;  %s967_s12 = scalar_lea.sflag [#allocation4], %s966_s9 }
 0x1a4   : > { %p2227_p7 = scmp.ge.s32.totalorder %s2225_s23, 2 }
 0x1a6   : > { %p1352_p10 = pnand %p2227_p7, %p2226_p0 }
 0x1a8   : > { %p1353_p13 = pneg %p1352_p10 }
 0x1aa   : > { %1705 = dma.done.wait (%p1353_p13), %s967_s12, 128  }
 0x1ab   : > { %1707 = vsyncadd (%p1353_p13), %s967_s12, 4294967168  ;;  %s2228_s17 = sadd.s32 4294967294, %s2225_s23  }
 0x1ac   : > { %s975_s21 = sand.u32 1, %s2228_s17  }
 0x1ad   : > { %s976_s26 = scalar_lea.sflag [#allocation15], %s975_s21 }
 0x1ae   : > { %1709 = dma.done.wait (%p1353_p13), %s976_s26, 256  }
 0x1af   : > { %1711 = vsyncadd (%p1353_p13), %s976_s26, 4294967040  ;;  %s36_s22 = sadd.s32 1, %s2225_s23   ;;  %s2229_s24 = sld [smem:[#allocation28_spill]] }
 0x1b0   : > { %p33_p12 = scmp.ge.s32.totalorder %s36_s22, 4   ;;  %s2230_s20 = sld [smem:[#allocation24_spill]] }
 0x1b1   : > { %s2231_s21 = sld [smem:[#allocation27_spill]]  ;;  %s2232_s17 = smov %s1718_s18 }
 0x1b2   : > { %s2233_s18 = smov %s1722_s19  ;;  %35 = sbr.rel (!%p33_p12) target bundleno = 19 (0x13), region = 181 }
 0x1b5   : > { %s2234_s19 = smov %s2229_s24 }
 0x1b7   :  { %990 = vsyncpa [#allocation3], 1 }
 0x1b8   :  { %992 = vsyncpa [#allocation3 + $0x1], 1 }
 0x1b9   :  { %993 = vsyncpa [#allocation6], 1 }
 0x1ba   :  { %995 = vsyncpa [#allocation6 + $0x1], 1 }
 0x1bb   :  { %996 = vsyncpa [#allocation9], 1 }
 0x1bc   :  { %997 = vsyncpa [#allocation12], 1 }
 0x1bd   :  { %998 = vsyncpa [#allocation4], 1 }
 0x1be   :  { %1000 = vsyncpa [#allocation4 + $0x1], 1 }
 0x1bf   :  { %1001 = vsyncpa [#allocation15], 1 }
 0x1c0   :  { %1003 = vsyncpa [#allocation15 + $0x1], 1 }

</bundles_post_ra>
